<compile_context>
chip_gen: v7x
topology: tpu7x:2x2x1
jax: 0.10.0
libtpu: 0.0.40
codegen_flags: <defaults>
</compile_context>

<pallas_src>
import math
import jax
import jax.numpy as jnp
from jax.experimental import pallas as pl
from jax.experimental.pallas import tpu as pltpu


_MIN_MULTISTEP_BYTES = 1 << 20       # below this, a single block is fine
_TARGET_PIPELINE_STEPS = 8           # keep >= ~8 grid steps so DMAs overlap


def _prompt_kernel(x_ref, w_ref, o_ref):
    # (tile_n, tile_w) * (1, tile_w) broadcast multiply on the VPU.
    o_ref[...] = x_ref[...] * w_ref[...]


def _physical_vmem_bytes():
    try:
        info = pltpu.get_tpu_info()
        v = getattr(info, "vmem_capacity_bytes", None)
        if isinstance(v, int) and v > 0:
            return v
    except Exception:
        pass
    return None


def _round_up(x, m):
    return ((x + m - 1) // m) * m


def prompt_forward(node_embedding: jax.Array,
                   weight: jax.Array,
                   *,
                   vmem_budget_bytes: int = 32 * 1024 * 1024,
                   donate_input: bool = False) -> jax.Array:
    """node_embedding: (N, H), weight: (1, H) -> (N, H) == node_embedding * weight."""
    N, H = node_embedding.shape
    assert weight.shape == (1, H), f"weight must be (1, {H}), got {weight.shape}"
    dtype = node_embedding.dtype
    itemsize = jnp.dtype(dtype).itemsize

    x, w = node_embedding, weight

    # ---- lane-dense fold ---------------------------------------------------
    # H < 128 lowers to masked (vst.msk) partial stores and wastes most lanes.
    # Row-major reshape preserves element order, so folding rows to a last dim
    # of lcm(H, 128) and tiling the weight reproduces exactly the same
    # broadcast (pure layout plumbing, zero extra compute).
    folded = False
    if H < 128:
        w_fold = math.lcm(H, 128)
        if (N * H) % w_fold == 0:
            x = x.reshape((N * H) // w_fold, w_fold)
            w = jnp.tile(w, (1, w_fold // H))
            folded = True

    Nw, W = x.shape

    # ---- generation-aware VMEM budget ---------------------------------------
    phys_vmem = _physical_vmem_bytes()
    if phys_vmem is not None:
        # leave ~30% headroom (v7x has only 64 MiB VMEM per TensorCore)
        vmem_budget_bytes = min(vmem_budget_bytes, int(phys_vmem * 0.7))

    pack = 8 * max(1, 4 // itemsize)             # 8 f32 / 16 bf16 / 32 int8 sublanes
    per_buf = max(vmem_budget_bytes // 4, pack * 128 * itemsize)

    # ---- lane-axis tiling (only if a single pack-row stripe of full width
    # would not fit in the per-buffer budget, i.e. very wide H) ----------------
    if W * pack * itemsize <= per_buf:
        tile_w = W
    else:
        tile_w = max(128, ((per_buf // (pack * itemsize)) // 128) * 128)
    grid_w = pl.cdiv(W, tile_w)

    # ---- row-tile size: big, but never a single block for medium arrays -----
    rows_fit = per_buf // (tile_w * itemsize)
    tile_n = max(pack, (rows_fit // pack) * pack)

    total_bytes = Nw * W * itemsize
    if total_bytes >= _MIN_MULTISTEP_BYTES and grid_w == 1:
        # Keep >= ~8 pipeline steps so the in/out DMA streams of adjacent tiles
        # overlap and the row axis can actually be split across TensorCores.
        cap = _round_up(pl.cdiv(Nw, _TARGET_PIPELINE_STEPS), pack)
        tile_n = min(tile_n, max(pack, cap))

    if tile_n >= Nw:
        tile_n = Nw                              # full dim: always a legal block
    grid_rows = pl.cdiv(Nw, tile_n)
    grid = (grid_rows, grid_w)

    # ---- vmem_limit from the actual footprint --------------------------------
    tile_bytes = tile_n * tile_w * itemsize
    vmem_limit = 4 * tile_bytes + 2 * tile_w * itemsize + (2 << 20)   # 2 in + 2 out + weight + slack
    vmem_limit = max(vmem_limit, 4 << 20)
    if phys_vmem is not None:
        vmem_limit = min(vmem_limit, phys_vmem)

    extra_kwargs = {}
    if donate_input:
        # Output (Nw, W) matches the (possibly reshaped) input exactly -> reuse
        # the input HBM buffer. Caller must not need node_embedding afterwards.
        extra_kwargs["input_output_aliases"] = {0: 0}

    cost = pl.CostEstimate(
        flops=N * H,
        transcendentals=0,
        bytes_accessed=(2 * N * H + H) * itemsize,
    )

    def build(dim_sems):
        return pl.pallas_call(
            _prompt_kernel,
            out_shape=jax.ShapeDtypeStruct((Nw, W), dtype),
            grid=grid,
            in_specs=[
                pl.BlockSpec((tile_n, tile_w), lambda i, j: (i, j)),   # row/col tile
                pl.BlockSpec((1, tile_w), lambda i, j: (0, j)),        # weight slice
            ],
            out_specs=pl.BlockSpec((tile_n, tile_w), lambda i, j: (i, j)),
            compiler_params=pltpu.CompilerParams(
                dimension_semantics=dim_sems,
                vmem_limit_bytes=int(vmem_limit),
            ),
            cost_estimate=cost,
            **extra_kwargs,
        )

    parallel = getattr(pltpu, "PARALLEL", "parallel")
    core_parallel = getattr(pltpu, "CORE_PARALLEL", None)
    candidates = []
    if core_parallel is not None and grid_rows >= 2:
        # Shard row tiles across the 2 TensorCores on v7x (memory-bound -> ~2x BW).
        candidates.append((core_parallel, parallel))
    candidates.append((parallel, parallel))
    candidates.append(("parallel", "arbitrary"))

    out = None
    last_err = None
    for sems in candidates:
        try:
            out = jax.block_until_ready(build(sems)(x, w))
            break
        except Exception as e:  # fall back (e.g. core_parallel unsupported on this gen)
            last_err = e
    if out is None:
        raise last_err

    if folded:
        out = out.reshape(N, H)
    return out


def init_prompt_weight(key, hidden_dim: int, dtype=jnp.float32) -> jax.Array:
    # xavier_uniform_ on a (1, hidden_dim) tensor:
    #   fan_in = hidden_dim, fan_out = 1, bound = sqrt(6 / (fan_in + fan_out))
    bound = math.sqrt(6.0 / (hidden_dim + 1))
    return jax.random.uniform(key, (1, hidden_dim), dtype=dtype,
                              minval=-bound, maxval=bound)


# TODO(synk): compute_prototype_logits / compute_prototype_loss are auxiliary
# training utilities (not part of forward) and are not translated here.

if __name__ == "__main__":
    key = jax.random.PRNGKey(0)
    keys = jax.random.split(key, 8)

    # --- case 1: module-sized test (8 nodes, hidden_dim=32, f32) -------------
    # H=32 < 128 -> lane-dense fold path ((8,32) -> (2,128)).
    N, H = 8, 32
    x = jax.random.normal(keys[0], (N, H), dtype=jnp.float32)
    w = init_prompt_weight(keys[1], H)
    out = jax.block_until_ready(prompt_forward(x, w))
    ref = x * w
    assert out.shape == (N, H)
    assert jnp.allclose(out, ref, atol=1e-6, rtol=1e-6)

    # --- case 2: ragged row-tiled path, no wrapper pad/slice ------------------
    # Forced tiny VMEM budget: tile_n=16, grid=(7,1), last block masked on write.
    N2, H2 = 100, 256
    x2 = jax.random.normal(keys[2], (N2, H2), dtype=jnp.float32)
    w2 = init_prompt_weight(keys[3], H2)
    out2 = jax.block_until_ready(
        prompt_forward(x2, w2, vmem_budget_bytes=64 * 1024))
    ref2 = x2 * w2
    assert out2.shape == (N2, H2)
    assert jnp.allclose(out2, ref2, atol=1e-6, rtol=1e-6)

    # --- case 3: bf16 (sublane pack factor = 16), tiny array -> single block --
    N3, H3 = 64, 128
    x3 = jax.random.normal(keys[4], (N3, H3), dtype=jnp.float32).astype(jnp.bfloat16)
    w3 = init_prompt_weight(keys[5], H3).astype(jnp.bfloat16)
    out3 = jax.block_until_ready(prompt_forward(x3, w3))
    ref3 = x3 * w3
    assert out3.shape == (N3, H3)
    assert jnp.allclose(out3.astype(jnp.float32), ref3.astype(jnp.float32),
                        atol=1e-2, rtol=1e-2)

    # --- case 4: medium array (1 MiB) -> multi-step pipelined grid (8 tiles) --
    N4, H4 = 2048, 128
    x4 = jax.random.normal(keys[6], (N4, H4), dtype=jnp.float32)
    w4 = init_prompt_weight(keys[7], H4)
    out4 = jax.block_until_ready(prompt_forward(x4, w4))
    ref4 = x4 * w4
    assert out4.shape == (N4, H4)
    assert jnp.allclose(out4, ref4, atol=1e-6, rtol=1e-6)

    print("KERNEL_OK")
</pallas_src>

<mosaic_0001>
module attributes {stable_mosaic.version = 11 : i64} {
  func.func @_prompt_kernel(%arg0: i32, %arg1: i32, %arg2: memref<2x128xf32, #tpu.memory_space<vmem>>, %arg3: memref<1x128xf32, #tpu.memory_space<vmem>>, %arg4: memref<2x128xf32, #tpu.memory_space<vmem>>) attributes {dimension_semantics = [#tpu.dimension_semantics<parallel>, #tpu.dimension_semantics<parallel>], iteration_bounds = array<i64: 1, 1>, scalar_prefetch = 0 : i64, scratch_operands = 0 : i64, tpu.core_type = #tpu.core_type<tc>, window_params = [{transform_indices = @transform_0, window_bounds = array<i64: 2, 128>}, {transform_indices = @transform_1, window_bounds = array<i64: 1, 128>}, {transform_indices = @transform_2, window_bounds = array<i64: 2, 128>}]} {
    %c0 = arith.constant 0 : index
    %c0_0 = arith.constant 0 : index
    %0 = vector.load %arg2[%c0, %c0_0] : memref<2x128xf32, #tpu.memory_space<vmem>>, vector<2x128xf32>
    %c0_1 = arith.constant 0 : index
    %c0_2 = arith.constant 0 : index
    %1 = vector.load %arg3[%c0_1, %c0_2] : memref<1x128xf32, #tpu.memory_space<vmem>>, vector<1x128xf32>
    %2 = vector.broadcast %1 : vector<1x128xf32> to vector<2x128xf32>
    %3 = arith.mulf %0, %2 : vector<2x128xf32>
    %c0_3 = arith.constant 0 : index
    %c0_4 = arith.constant 0 : index
    %4 = vector.load %arg4[%c0_3, %c0_4] : memref<2x128xf32, #tpu.memory_space<vmem>>, vector<2x128xf32>
    tpu.vector_store %arg4[%c0_3, %c0_4], %3 {strides = array<i32>} : memref<2x128xf32, #tpu.memory_space<vmem>>, vector<2x128xf32>,
    return
  }
  func.func @transform_0(%arg0: i32, %arg1: i32) -> (i32, i32) {
    %c0_i32 = arith.constant 0 : i32
    return %arg0, %arg1 : i32, i32
  }
  func.func @transform_1(%arg0: i32, %arg1: i32) -> (i32, i32) {
    %c0_i32 = arith.constant 0 : i32
    %c0_i32_0 = arith.constant 0 : i32
    return %c0_i32, %arg1 : i32, i32
  }
  func.func @transform_2(%arg0: i32, %arg1: i32) -> (i32, i32) {
    %c0_i32 = arith.constant 0 : i32
    return %arg0, %arg1 : i32, i32
  }
}

module attributes {stable_mosaic.version = 11 : i64} {
  func.func @_prompt_kernel(%arg0: i32, %arg1: i32, %arg2: memref<2x128xf32, #tpu.memory_space<vmem>>, %arg3: memref<1x128xf32, #tpu.memory_space<vmem>>, %arg4: memref<2x128xf32, #tpu.memory_space<vmem>>) attributes {dimension_semantics = [#tpu.dimension_semantics<parallel>, #tpu.dimension_semantics<arbitrary>], iteration_bounds = array<i64: 1, 1>, scalar_prefetch = 0 : i64, scratch_operands = 0 : i64, tpu.core_type = #tpu.core_type<tc>, window_params = [{transform_indices = @transform_0, window_bounds = array<i64: 2, 128>}, {transform_indices = @transform_1, window_bounds = array<i64: 1, 128>}, {transform_indices = @transform_2, window_bounds = array<i64: 2, 128>}]} {
    %c0 = arith.constant 0 : index
    %c0_0 = arith.constant 0 : index
    %0 = vector.load %arg2[%c0, %c0_0] : memref<2x128xf32, #tpu.memory_space<vmem>>, vector<2x128xf32>
    %c0_1 = arith.constant 0 : index
    %c0_2 = arith.constant 0 : index
    %1 = vector.load %arg3[%c0_1, %c0_2] : memref<1x128xf32, #tpu.memory_space<vmem>>, vector<1x128xf32>
    %2 = vector.broadcast %1 : vector<1x128xf32> to vector<2x128xf32>
    %3 = arith.mulf %0, %2 : vector<2x128xf32>
    %c0_3 = arith.constant 0 : index
    %c0_4 = arith.constant 0 : index
    %4 = vector.load %arg4[%c0_3, %c0_4] : memref<2x128xf32, #tpu.memory_space<vmem>>, vector<2x128xf32>
    tpu.vector_store %arg4[%c0_3, %c0_4], %3 {strides = array<i32>} : memref<2x128xf32, #tpu.memory_space<vmem>>, vector<2x128xf32>,
    return
  }
  func.func @transform_0(%arg0: i32, %arg1: i32) -> (i32, i32) {
    %c0_i32 = arith.constant 0 : i32
    return %arg0, %arg1 : i32, i32
  }
  func.func @transform_1(%arg0: i32, %arg1: i32) -> (i32, i32) {
    %c0_i32 = arith.constant 0 : i32
    %c0_i32_0 = arith.constant 0 : i32
    return %c0_i32, %arg1 : i32, i32
  }
  func.func @transform_2(%arg0: i32, %arg1: i32) -> (i32, i32) {
    %c0_i32 = arith.constant 0 : i32
    return %arg0, %arg1 : i32, i32
  }
}

</mosaic_0001>

<bundles_post_ra>
// kernel: tpu_custom_call.1
= control target key start
LH: loop header
LB: loop body
LE: loop exit
PB: predicated region body
PF: predicated region fallthrough
CT: control target
= control target key end

     0   :  { %7 = vsyncpa [#allocation3], 0  ;;  %s144_s0 = inlined_call_operand.hbm [shape: f32[2,128], index: 0, kind: input, shape index: {}]   ;;  %s145_s1 = inlined_call_operand.vmem [shape: f32[1,128], index: 1, kind: input, shape index: {}]   ;;  %s146_s2 = inlined_call_operand.hbm [shape: f32[2,128], index: 2, kind: output, shape index: {}]  }
   0x1   :  { %8 = vsyncpa [#allocation4], 0  ;;  %s100_s9 = smov [#allocation2]   ;;  %s52_s13 = scalar_lea.hbm %s144_s0, 32 }
   0x2   :  { %s15_s10 = sshll.u32 %s100_s9, 4  ;;  %p53_p0 = scmp.ne.s32.totalorder %s144_s0, %s52_s13  ;;  %s16_s10 = int_to_ptr.vmem [resolvable:$true] %s15_s10 }
   0x3   :  { %p56_p1 = scmp.lt.u32.totalorder %s52_s13, %s144_s0 }
   0x5   :  { %p58_p2 = pnand %p56_p1, %p53_p0 }
   0x7   :  { %61 = shalt.err (!%p58_p2)
}
   0x8   :  { %s62_s18 = scalar_lea.vmem %s16_s10, 32  ;;  %p67_p4 = scmp.lt.s32.totalorder %s16_s10, %s16_s10 }
   0x9   :  { %p63_p3 = scmp.ne.s32.totalorder %s16_s10, %s62_s18  ;;  %p68_p5 = scmp.lt.s32.totalorder %s62_s18, %s62_s18 }
   0xb   :  { %p69_p6 = por %p68_p5, %p67_p4 }
   0xd   :  { %p70_p7 = pnand %p69_p6, %p63_p3 }
   0xf   :  { %73 = shalt.err (!%p70_p7)
}
  0x10   :  { %18 = dma.hbm_to_vmem [thread:$0]  %s144_s0, 32, %s16_s10, [#allocation3]  }
  0x11   :  { %96 = dma.done.wait [#allocation3], 32  }
  0x12   :  { %97 = vsyncadd [#allocation3], 4294967264  ;;  %s101_s21 = smov [#allocation5]   ;;  %v24_v0 = vld [vmem:[#allocation2] sm:$0x3] }
  0x13   :  { %s40_s22 = sshll.u32 %s101_s21, 4  ;;  %v49_v1 = vld [vmem:[%s145_s1] ss:$0 sm:$0xff]  ;;  %s41_s22 = int_to_ptr.vmem [resolvable:$true] %s40_s22 }
  0x14   :  { %v32_v2 = vmul.f32 %v49_v1, %v24_v0  ;;  %s74_s25 = scalar_lea.vmem %s41_s22, 32  ;;  %p79_p9 = scmp.lt.s32.totalorder %s41_s22, %s41_s22 }
  0x15   :  { %p75_p8 = scmp.ne.s32.totalorder %s41_s22, %s74_s25  ;;  %p80_p10 = scmp.lt.s32.totalorder %s74_s25, %s74_s25 }
  0x16   :  { %33 = vst [vmem:[#allocation5] sm:$0x3] %v32_v2 }
  0x17   :  { %p81_p11 = por %p80_p10, %p79_p9 }
  0x19   :  { %p82_p12 = pnand %p81_p11, %p75_p8 }
  0x1b   :  { %85 = shalt.err (!%p82_p12)
}
  0x1c   :  { %s86_s27 = scalar_lea.hbm %s146_s2, 32 }
  0x1d   :  { %p87_p13 = scmp.ne.s32.totalorder %s146_s2, %s86_s27  ;;  %p90_p0 = scmp.lt.u32.totalorder %s86_s27, %s146_s2 }
  0x1f   :  { %p92_p1 = pnand %p90_p0, %p87_p13 }
  0x21   :  { %95 = shalt.err (!%p92_p1)
}
  0x22   :  { %43 = dma.vmem_to_hbm [thread:$0]  %s41_s22, 32, %s146_s2, [#allocation4]  }
  0x23   :  { %98 = dma.done.wait [#allocation4], 32  }
  0x24   :  { %99 = vsyncadd [#allocation4], 4294967264 }
  0x25   :  { %47 = vsyncpa [#allocation3], 1 }
  0x26   :  { %48 = vsyncpa [#allocation4], 1 }

// kernel: tpu_custom_call.1
= control target key start
LH: loop header
LB: loop body
LE: loop exit
PB: predicated region body
PF: predicated region fallthrough
CT: control target
= control target key end

     0   :  { %7 = vsyncpa [#allocation3], 0  ;;  %s144_s0 = inlined_call_operand.hbm [shape: f32[2,128], index: 0, kind: input, shape index: {}]   ;;  %s145_s1 = inlined_call_operand.vmem [shape: f32[1,128], index: 1, kind: input, shape index: {}]   ;;  %s146_s2 = inlined_call_operand.hbm [shape: f32[2,128], index: 2, kind: output, shape index: {}]  }
   0x1   :  { %8 = vsyncpa [#allocation4], 0  ;;  %s100_s9 = smov [#allocation2]   ;;  %s52_s13 = scalar_lea.hbm %s144_s0, 32 }
   0x2   :  { %s15_s10 = sshll.u32 %s100_s9, 4  ;;  %p53_p0 = scmp.ne.s32.totalorder %s144_s0, %s52_s13  ;;  %s16_s10 = int_to_ptr.vmem [resolvable:$true] %s15_s10 }
   0x3   :  { %p56_p1 = scmp.lt.u32.totalorder %s52_s13, %s144_s0 }
   0x5   :  { %p58_p2 = pnand %p56_p1, %p53_p0 }
   0x7   :  { %61 = shalt.err (!%p58_p2)
}
   0x8   :  { %s62_s18 = scalar_lea.vmem %s16_s10, 32  ;;  %p67_p4 = scmp.lt.s32.totalorder %s16_s10, %s16_s10 }
   0x9   :  { %p63_p3 = scmp.ne.s32.totalorder %s16_s10, %s62_s18  ;;  %p68_p5 = scmp.lt.s32.totalorder %s62_s18, %s62_s18 }
   0xb   :  { %p69_p6 = por %p68_p5, %p67_p4 }
   0xd   :  { %p70_p7 = pnand %p69_p6, %p63_p3 }
   0xf   :  { %73 = shalt.err (!%p70_p7)
}
  0x10   :  { %18 = dma.hbm_to_vmem [thread:$0]  %s144_s0, 32, %s16_s10, [#allocation3]  }
  0x11   :  { %96 = dma.done.wait [#allocation3], 32  }
  0x12   :  { %97 = vsyncadd [#allocation3], 4294967264  ;;  %s101_s21 = smov [#allocation5]   ;;  %v24_v0 = vld [vmem:[#allocation2] sm:$0x3] }
  0x13   :  { %s40_s22 = sshll.u32 %s101_s21, 4  ;;  %v49_v1 = vld [vmem:[%s145_s1] ss:$0 sm:$0xff]  ;;  %s41_s22 = int_to_ptr.vmem [resolvable:$true] %s40_s22 }
  0x14   :  { %v32_v2 = vmul.f32 %v49_v1, %v24_v0  ;;  %s74_s25 = scalar_lea.vmem %s41_s22, 32  ;;  %p79_p9 = scmp.lt.s32.totalorder %s41_s22, %s41_s22 }
  0x15   :  { %p75_p8 = scmp.ne.s32.totalorder %s41_s22, %s74_s25  ;;  %p80_p10 = scmp.lt.s32.totalorder %s74_s25, %s74_s25 }
  0x16   :  { %33 = vst [vmem:[#allocation5] sm:$0x3] %v32_v2 }
  0x17   :  { %p81_p11 = por %p80_p10, %p79_p9 }
  0x19   :  { %p82_p12 = pnand %p81_p11, %p75_p8 }
  0x1b   :  { %85 = shalt.err (!%p82_p12)
}
  0x1c   :  { %s86_s27 = scalar_lea.hbm %s146_s2, 32 }
  0x1d   :  { %p87_p13 = scmp.ne.s32.totalorder %s146_s2, %s86_s27  ;;  %p90_p0 = scmp.lt.u32.totalorder %s86_s27, %s146_s2 }
  0x1f   :  { %p92_p1 = pnand %p90_p0, %p87_p13 }
  0x21   :  { %95 = shalt.err (!%p92_p1)
}
  0x22   :  { %43 = dma.vmem_to_hbm [thread:$0]  %s41_s22, 32, %s146_s2, [#allocation4]  }
  0x23   :  { %98 = dma.done.wait [#allocation4], 32  }
  0x24   :  { %99 = vsyncadd [#allocation4], 4294967264 }
  0x25   :  { %47 = vsyncpa [#allocation3], 1 }
  0x26   :  { %48 = vsyncpa [#allocation4], 1 }

</bundles_post_ra>
